<compile_context>
chip_gen: v7x
topology: tpu7x:2x2x1
jax: 0.10.0
libtpu: 0.0.40
codegen_flags: <defaults>
</compile_context>

<pallas_src>
import jax
import jax.numpy as jnp
from jax.experimental import pallas as pl
from jax.experimental.pallas import tpu as pltpu

NOUT = 128  # lane-dense fused output width: [start(2) | end(2) | zero pad]


def _round_up(x, m):
    return (x + m - 1) // m * m


def mrc_head_kernel(x_ref, w1_ref, b1_ref, wse_ref, bse_ref, out_ref):
    # x_ref:   (tm, H)    native dtype (f32 or bf16)
    # w1_ref:  (H, MID)   bf16         b1_ref:  (1, MID)  f32
    # wse_ref: (MID, 128) bf16 = [W_start | W_end | 0]
    # bse_ref: (1, 128)   f32  = [b_start | b_end | 0]
    # out_ref: (tm, 128)  f32  = [start_logits | end_logits | junk]
    x = x_ref[...].astype(jnp.bfloat16)              # bf16 MXU pass, f32 acc
    h = jnp.dot(x, w1_ref[...], preferred_element_type=jnp.float32)
    h = jnp.maximum(h + b1_ref[...], 0.0)            # bias + ReLU in f32
    # nn.Dropout is identity at inference.
    out_ref[...] = (jnp.dot(h.astype(jnp.bfloat16), wse_ref[...],
                            preferred_element_type=jnp.float32)
                    + bse_ref[...])


def mrc_head(seq_out, w_mid, b_mid, w_start, b_start, w_end, b_end, *,
             tm=2048, vmem_budget_bytes=24 << 20):
    """Returns (start_logits, end_logits), each [B, S, 2]."""
    B, S, H = seq_out.shape
    MID = w_mid.shape[1]
    M = B * S
    x = seq_out.reshape(M, H)                # metadata reshape; no copy / pad
    x_itemsize = jnp.dtype(x.dtype).itemsize

    # Fused, lane-dense projection: (MID, 128) = [W_start | W_end | zeros].
    w_se = jnp.zeros((MID, NOUT), jnp.bfloat16)
    w_se = w_se.at[:, 0:2].set(w_start.astype(jnp.bfloat16))
    w_se = w_se.at[:, 2:4].set(w_end.astype(jnp.bfloat16))
    b_se = jnp.zeros((1, NOUT), jnp.float32)
    b_se = b_se.at[:, 0:2].set(b_start.reshape(1, 2).astype(jnp.float32))
    b_se = b_se.at[:, 2:4].set(b_end.reshape(1, 2).astype(jnp.float32))

    # Row tile: as big as the VMEM budget for double-buffered x + out blocks
    # allows (amortizes ~0.35us per grid step), then adjust so the step count
    # is even whenever it is > 1 so both v7x TensorCores stay busy.
    per_row = 2 * H * x_itemsize + 2 * NOUT * 4
    tm_cap = max(8, (vmem_budget_bytes // per_row) // 8 * 8)
    tm = min(max(8, _round_up(tm, 8)), tm_cap)
    n_steps = pl.cdiv(M, tm)
    if n_steps == 1 and M >= 16:
        n_steps = 2
    elif n_steps > 1 and n_steps % 2 == 1:
        n_steps += 1
    tm = max(8, _round_up(pl.cdiv(M, n_steps), 8))
    grid = (pl.cdiv(M, tm),)

    flops = 2 * M * (H * MID + MID * NOUT)
    bytes_accessed = (M * H * x_itemsize                # x, read once, native
                      + (H * MID + MID * NOUT) * 2      # bf16 weights
                      + (MID + NOUT) * 4                # f32 biases
                      + M * NOUT * 4)                   # lane-dense f32 out
    cost = pl.CostEstimate(flops=flops, transcendentals=0,
                           bytes_accessed=bytes_accessed)

    w1 = w_mid.astype(jnp.bfloat16)
    b1 = b_mid.reshape(1, MID).astype(jnp.float32)

    def run(constant_mode):
        const_kw = {} if constant_mode is None else {"pipeline_mode": constant_mode}
        return pl.pallas_call(
            mrc_head_kernel,
            out_shape=jax.ShapeDtypeStruct((M, NOUT), jnp.float32),
            grid_spec=pltpu.PrefetchScalarGridSpec(
                num_scalar_prefetch=0,
                grid=grid,
                in_specs=[
                    pl.BlockSpec((tm, H), lambda i: (i, 0)),            # x rows
                    pl.BlockSpec((H, MID), lambda i: (0, 0), **const_kw),   # W_mid
                    pl.BlockSpec((1, MID), lambda i: (0, 0), **const_kw),   # b_mid
                    pl.BlockSpec((MID, NOUT), lambda i: (0, 0), **const_kw),  # [Ws|We|0]
                    pl.BlockSpec((1, NOUT), lambda i: (0, 0), **const_kw),    # [bs|be|0]
                ],
                out_specs=pl.BlockSpec((tm, NOUT), lambda i: (i, 0)),
            ),
            compiler_params=pltpu.CompilerParams(
                dimension_semantics=("parallel",),
                vmem_limit_bytes=32 << 20),
            cost_estimate=cost,
        )(x, w1, b1, w_se, b_se)

    try:
        # Single-buffer the constant weight/bias blocks (constant index_map,
        # no per-step re-DMA needed) to reclaim VMEM for the x tile.
        out = run(pl.Buffered(1))
    except Exception:
        # Fallback for Pallas builds without pipeline_mode support.
        out = run(None)

    start_logits = out[:, 0:2].reshape(B, S, 2)
    end_logits = out[:, 2:4].reshape(B, S, 2)
    return start_logits, end_logits


def reference_head(seq_out, w_mid, b_mid, w_start, b_start, w_end, b_end):
    h = jnp.maximum(seq_out @ w_mid + b_mid[0], 0.0)
    return h @ w_start + b_start[0], h @ w_end + b_end[0]


if __name__ == "__main__":
    # Small shapes consistent with the module: batch=2, seq=8, hidden=32,
    # mid_linear_dims=128, 2 output classes per position.
    B, S, H, MID = 2, 8, 32, 128

    key = jax.random.PRNGKey(0)
    k0, k1, k2, k3 = jax.random.split(key, 4)

    # Deterministic synthetic "BERT output".
    seq_out = jax.random.normal(k0, (B, S, H), dtype=jnp.float32)

    # Parameters: weights random (deterministic), biases zero per _init_weights.
    w_mid = jax.random.normal(k1, (H, MID), dtype=jnp.float32) * 0.02
    b_mid = jnp.zeros((1, MID), dtype=jnp.float32)
    w_start = jax.random.normal(k2, (MID, 2), dtype=jnp.float32) * 0.02
    b_start = jnp.zeros((1, 2), dtype=jnp.float32)
    w_end = jax.random.normal(k3, (MID, 2), dtype=jnp.float32) * 0.02
    b_end = jnp.zeros((1, 2), dtype=jnp.float32)

    start_logits, end_logits = mrc_head(
        seq_out, w_mid, b_mid, w_start, b_start, w_end, b_end)
    jax.block_until_ready((start_logits, end_logits))

    # Correctness check against a pure-JAX f32 reference of the same math.
    ref_start, ref_end = reference_head(
        seq_out, w_mid, b_mid, w_start, b_start, w_end, b_end)
    assert start_logits.shape == (B, S, 2) and end_logits.shape == (B, S, 2)
    # bf16 MXU inputs (f32 accumulation) -> slightly looser tolerance vs f32.
    assert jnp.allclose(start_logits, ref_start, atol=5e-3, rtol=5e-2)
    assert jnp.allclose(end_logits, ref_end, atol=5e-3, rtol=5e-2)

    print("KERNEL_OK")
</pallas_src>

<mosaic_0001>
module attributes {stable_mosaic.version = 11 : i64} {
  func.func @mrc_head_kernel(%arg0: i32, %arg1: memref<8x32xf32, #tpu.memory_space<vmem>>, %arg2: memref<32x128xbf16, #tpu.memory_space<vmem>>, %arg3: memref<1x128xf32, #tpu.memory_space<vmem>>, %arg4: memref<128x128xbf16, #tpu.memory_space<vmem>>, %arg5: memref<1x128xf32, #tpu.memory_space<vmem>>, %arg6: memref<8x128xf32, #tpu.memory_space<vmem>>) attributes {dimension_semantics = [#tpu.dimension_semantics<parallel>], iteration_bounds = array<i64: 2>, scalar_prefetch = 0 : i64, scratch_operands = 0 : i64, tpu.core_type = #tpu.core_type<tc>, window_params = [{transform_indices = @transform_0, window_bounds = array<i64: 8, 32>}, {pipeline_mode = #tpu.pipeline_mode<synchronous>, transform_indices = @transform_1, window_bounds = array<i64: 32, 128>}, {pipeline_mode = #tpu.pipeline_mode<synchronous>, transform_indices = @transform_2, window_bounds = array<i64: 1, 128>}, {pipeline_mode = #tpu.pipeline_mode<synchronous>, transform_indices = @transform_3, window_bounds = array<i64: 128, 128>}, {pipeline_mode = #tpu.pipeline_mode<synchronous>, transform_indices = @transform_4, window_bounds = array<i64: 1, 128>}, {transform_indices = @transform_5, window_bounds = array<i64: 8, 128>}]} {
    %c0 = arith.constant 0 : index
    %c0_0 = arith.constant 0 : index
    %0 = vector.load %arg1[%c0, %c0_0] : memref<8x32xf32, #tpu.memory_space<vmem>>, vector<8x32xf32>
    %1 = arith.truncf %0 : vector<8x32xf32> to vector<8x32xbf16>
    %c0_1 = arith.constant 0 : index
    %c0_2 = arith.constant 0 : index
    %2 = vector.load %arg2[%c0_1, %c0_2] : memref<32x128xbf16, #tpu.memory_space<vmem>>, vector<32x128xbf16>
    %cst = arith.constant dense<0.000000e+00> : vector<8x128xf32>
    %3 = tpu.matmul %1, %2, %cst {dimension_numbers = #tpu.dot_dimension_numbers<[1], [0], [0], [1], [0, 0, 1, 1], [], []>} : vector<8x32xbf16>, vector<32x128xbf16>, vector<8x128xf32> -> vector<8x128xf32>
    %c0_3 = arith.constant 0 : index
    %c0_4 = arith.constant 0 : index
    %4 = vector.load %arg3[%c0_3, %c0_4] : memref<1x128xf32, #tpu.memory_space<vmem>>, vector<1x128xf32>
    %5 = vector.broadcast %4 : vector<1x128xf32> to vector<8x128xf32>
    %6 = arith.addf %3, %5 : vector<8x128xf32>
    %cst_5 = arith.constant 0.000000e+00 : f32
    %7 = vector.broadcast %cst_5 : f32 to vector<8x128xf32>
    %8 = arith.maximumf %6, %7 : vector<8x128xf32>
    %9 = arith.truncf %8 : vector<8x128xf32> to vector<8x128xbf16>
    %c0_6 = arith.constant 0 : index
    %c0_7 = arith.constant 0 : index
    %10 = vector.load %arg4[%c0_6, %c0_7] : memref<128x128xbf16, #tpu.memory_space<vmem>>, vector<128x128xbf16>
    %cst_8 = arith.constant dense<0.000000e+00> : vector<8x128xf32>
    %11 = tpu.matmul %9, %10, %cst_8 {dimension_numbers = #tpu.dot_dimension_numbers<[1], [0], [0], [1], [0, 0, 1, 1], [], []>} : vector<8x128xbf16>, vector<128x128xbf16>, vector<8x128xf32> -> vector<8x128xf32>
    %c0_9 = arith.constant 0 : index
    %c0_10 = arith.constant 0 : index
    %12 = vector.load %arg5[%c0_9, %c0_10] : memref<1x128xf32, #tpu.memory_space<vmem>>, vector<1x128xf32>
    %13 = vector.broadcast %12 : vector<1x128xf32> to vector<8x128xf32>
    %14 = arith.addf %11, %13 : vector<8x128xf32>
    %c0_11 = arith.constant 0 : index
    %c0_12 = arith.constant 0 : index
    %15 = vector.load %arg6[%c0_11, %c0_12] : memref<8x128xf32, #tpu.memory_space<vmem>>, vector<8x128xf32>
    tpu.vector_store %arg6[%c0_11, %c0_12], %14 {strides = array<i32>} : memref<8x128xf32, #tpu.memory_space<vmem>>, vector<8x128xf32>,
    return
  }
  func.func @transform_0(%arg0: i32) -> (i32, i32) {
    %c0_i32 = arith.constant 0 : i32
    %c0_i32_0 = arith.constant 0 : i32
    return %arg0, %c0_i32 : i32, i32
  }
  func.func @transform_1(%arg0: i32) -> (i32, i32) {
    %c0_i32 = arith.constant 0 : i32
    %c0_i32_0 = arith.constant 0 : i32
    %c0_i32_1 = arith.constant 0 : i32
    return %c0_i32, %c0_i32_0 : i32, i32
  }
  func.func @transform_2(%arg0: i32) -> (i32, i32) {
    %c0_i32 = arith.constant 0 : i32
    %c0_i32_0 = arith.constant 0 : i32
    %c0_i32_1 = arith.constant 0 : i32
    return %c0_i32, %c0_i32_0 : i32, i32
  }
  func.func @transform_3(%arg0: i32) -> (i32, i32) {
    %c0_i32 = arith.constant 0 : i32
    %c0_i32_0 = arith.constant 0 : i32
    %c0_i32_1 = arith.constant 0 : i32
    return %c0_i32, %c0_i32_0 : i32, i32
  }
  func.func @transform_4(%arg0: i32) -> (i32, i32) {
    %c0_i32 = arith.constant 0 : i32
    %c0_i32_0 = arith.constant 0 : i32
    %c0_i32_1 = arith.constant 0 : i32
    return %c0_i32, %c0_i32_0 : i32, i32
  }
  func.func @transform_5(%arg0: i32) -> (i32, i32) {
    %c0_i32 = arith.constant 0 : i32
    %c0_i32_0 = arith.constant 0 : i32
    return %arg0, %c0_i32 : i32, i32
  }
}

module attributes {stable_mosaic.version = 11 : i64} {
  func.func @mrc_head_kernel(%arg0: i32, %arg1: memref<8x32xf32, #tpu.memory_space<vmem>>, %arg2: memref<32x128xbf16, #tpu.memory_space<vmem>>, %arg3: memref<1x128xf32, #tpu.memory_space<vmem>>, %arg4: memref<128x128xbf16, #tpu.memory_space<vmem>>, %arg5: memref<1x128xf32, #tpu.memory_space<vmem>>, %arg6: memref<8x128xf32, #tpu.memory_space<vmem>>) attributes {dimension_semantics = [#tpu.dimension_semantics<parallel>], iteration_bounds = array<i64: 2>, scalar_prefetch = 0 : i64, scratch_operands = 0 : i64, tpu.core_type = #tpu.core_type<tc>, window_params = [{transform_indices = @transform_0, window_bounds = array<i64: 8, 32>}, {pipeline_mode = #tpu.pipeline_mode<synchronous>, transform_indices = @transform_1, window_bounds = array<i64: 32, 128>}, {pipeline_mode = #tpu.pipeline_mode<synchronous>, transform_indices = @transform_2, window_bounds = array<i64: 1, 128>}, {pipeline_mode = #tpu.pipeline_mode<synchronous>, transform_indices = @transform_3, window_bounds = array<i64: 128, 128>}, {pipeline_mode = #tpu.pipeline_mode<synchronous>, transform_indices = @transform_4, window_bounds = array<i64: 1, 128>}, {transform_indices = @transform_5, window_bounds = array<i64: 8, 128>}]} {
    %c0 = arith.constant 0 : index
    %c0_0 = arith.constant 0 : index
    %0 = vector.load %arg1[%c0, %c0_0] : memref<8x32xf32, #tpu.memory_space<vmem>>, vector<8x32xf32>
    %1 = arith.truncf %0 : vector<8x32xf32> to vector<8x32xbf16>
    %c0_1 = arith.constant 0 : index
    %c0_2 = arith.constant 0 : index
    %2 = vector.load %arg2[%c0_1, %c0_2] : memref<32x128xbf16, #tpu.memory_space<vmem>>, vector<32x128xbf16>
    %cst = arith.constant dense<0.000000e+00> : vector<8x128xf32>
    %3 = tpu.matmul %1, %2, %cst {dimension_numbers = #tpu.dot_dimension_numbers<[1], [0], [0], [1], [0, 0, 1, 1], [], []>} : vector<8x32xbf16>, vector<32x128xbf16>, vector<8x128xf32> -> vector<8x128xf32>
    %c0_3 = arith.constant 0 : index
    %c0_4 = arith.constant 0 : index
    %4 = vector.load %arg3[%c0_3, %c0_4] : memref<1x128xf32, #tpu.memory_space<vmem>>, vector<1x128xf32>
    %5 = vector.broadcast %4 : vector<1x128xf32> to vector<8x128xf32>
    %6 = arith.addf %3, %5 : vector<8x128xf32>
    %cst_5 = arith.constant 0.000000e+00 : f32
    %7 = vector.broadcast %cst_5 : f32 to vector<8x128xf32>
    %8 = arith.maximumf %6, %7 : vector<8x128xf32>
    %9 = arith.truncf %8 : vector<8x128xf32> to vector<8x128xbf16>
    %c0_6 = arith.constant 0 : index
    %c0_7 = arith.constant 0 : index
    %10 = vector.load %arg4[%c0_6, %c0_7] : memref<128x128xbf16, #tpu.memory_space<vmem>>, vector<128x128xbf16>
    %cst_8 = arith.constant dense<0.000000e+00> : vector<8x128xf32>
    %11 = tpu.matmul %9, %10, %cst_8 {dimension_numbers = #tpu.dot_dimension_numbers<[1], [0], [0], [1], [0, 0, 1, 1], [], []>} : vector<8x128xbf16>, vector<128x128xbf16>, vector<8x128xf32> -> vector<8x128xf32>
    %c0_9 = arith.constant 0 : index
    %c0_10 = arith.constant 0 : index
    %12 = vector.load %arg5[%c0_9, %c0_10] : memref<1x128xf32, #tpu.memory_space<vmem>>, vector<1x128xf32>
    %13 = vector.broadcast %12 : vector<1x128xf32> to vector<8x128xf32>
    %14 = arith.addf %11, %13 : vector<8x128xf32>
    %c0_11 = arith.constant 0 : index
    %c0_12 = arith.constant 0 : index
    %15 = vector.load %arg6[%c0_11, %c0_12] : memref<8x128xf32, #tpu.memory_space<vmem>>, vector<8x128xf32>
    tpu.vector_store %arg6[%c0_11, %c0_12], %14 {strides = array<i32>} : memref<8x128xf32, #tpu.memory_space<vmem>>, vector<8x128xf32>,
    return
  }
  func.func @transform_0(%arg0: i32) -> (i32, i32) {
    %c0_i32 = arith.constant 0 : i32
    %c0_i32_0 = arith.constant 0 : i32
    return %arg0, %c0_i32 : i32, i32
  }
  func.func @transform_1(%arg0: i32) -> (i32, i32) {
    %c0_i32 = arith.constant 0 : i32
    %c0_i32_0 = arith.constant 0 : i32
    %c0_i32_1 = arith.constant 0 : i32
    return %c0_i32, %c0_i32_0 : i32, i32
  }
  func.func @transform_2(%arg0: i32) -> (i32, i32) {
    %c0_i32 = arith.constant 0 : i32
    %c0_i32_0 = arith.constant 0 : i32
    %c0_i32_1 = arith.constant 0 : i32
    return %c0_i32, %c0_i32_0 : i32, i32
  }
  func.func @transform_3(%arg0: i32) -> (i32, i32) {
    %c0_i32 = arith.constant 0 : i32
    %c0_i32_0 = arith.constant 0 : i32
    %c0_i32_1 = arith.constant 0 : i32
    return %c0_i32, %c0_i32_0 : i32, i32
  }
  func.func @transform_4(%arg0: i32) -> (i32, i32) {
    %c0_i32 = arith.constant 0 : i32
    %c0_i32_0 = arith.constant 0 : i32
    %c0_i32_1 = arith.constant 0 : i32
    return %c0_i32, %c0_i32_0 : i32, i32
  }
  func.func @transform_5(%arg0: i32) -> (i32, i32) {
    %c0_i32 = arith.constant 0 : i32
    %c0_i32_0 = arith.constant 0 : i32
    return %arg0, %c0_i32 : i32, i32
  }
}

</mosaic_0001>

<bundles_post_ra>
// kernel: tpu_custom_call.1
= control target key start
LH: loop header
LB: loop body
LE: loop exit
PB: predicated region body
PF: predicated region fallthrough
CT: control target
= control target key end

     0   :  { %10 = vsyncpa [#allocation3], 0  ;;  %s1141_s0 = inlined_call_operand.hbm [shape: f32[16,32], index: 0, kind: input, shape index: {}]   ;;  %s1142_s1 = inlined_call_operand.hbm [shape: bf16[32,128], index: 1, kind: input, shape index: {}]   ;;  %s1143_s2 = inlined_call_operand.vmem [shape: f32[1,128], index: 2, kind: input, shape index: {}]   ;;  %s1144_s3 = inlined_call_operand.hbm [shape: bf16[128,128], index: 3, kind: input, shape index: {}]   ;;  %s1145_s4 = inlined_call_operand.vmem [shape: f32[1,128], index: 4, kind: input, shape index: {}]   ;;  %s1146_s5 = inlined_call_operand.hbm [shape: f32[16,128], index: 5, kind: output, shape index: {}]  }
   0x1   :  { %12 = vsyncpa [#allocation3 + $0x1], 0 }
   0x2   :  { %13 = vsyncpa [#allocation6], 0 }
   0x3   :  { %14 = vsyncpa [#allocation4], 0 }
   0x4   :  { %16 = vsyncpa [#allocation4 + $0x1], 0  ;;  %s902_s18 = smov 0   ;;  %s904_s19 = smov 0  }
   0x5   :  { %s906_s20 = smov 0   ;;  %s908_s21 = smov 0  }
   0x6 LB: > { %s923_s22 = sadd.s32 4294967295, %s862_s21   ;;  %s556_s23 = sadd.s32 4294967294, %s862_s21   ;;  %s862_s21 = sphi %s908_s21, %s1166_s21   ;;  %s858_s20 = sphi %s906_s20, %s1165_s20   ;;  %s854_s19 = sphi %s904_s19, %s1164_s19   ;;  %s850_s18 = sphi %s902_s18, %s1163_s18  }
   0x7   : > { %p42_p0 = scmp.ne.s32.totalorder %s854_s19, %s850_s18  ;;  %p1147_p1 = scmp.eq.s32.totalorder %s923_s22, 0 }
   0x8   : > { %p156_p3 = scmp.eq.s32.totalorder %s556_s23, 1  ;;  %p557_p5 = scmp.ge.s32.totalorder %s862_s21, 1 }
   0x9   : > { %p932_p4 = por %p1147_p1, %p42_p0  ;;  %p163_p7 = scmp.lt.s32.totalorder %s862_s21, 3 }
   0xa   : > { %p937_p6 = por %p156_p3, %p42_p0  ;;  %s864_s27 = smov [#allocation5]  }
   0xb   : > { %s1150_s24 = scalar_select %p932_p4, 1, 0 }
   0xc   : > { %s1151_s25 = scalar_select %p937_p6, 1, 0 }
   0xd   : > { %p942_p8 = pnand %p557_p5, %p163_p7  ;;  %s175_s28 = sshll.u32 %s864_s27, 4  ;;  %s946_s28 = int_to_ptr.vmem [resolvable:$true] %s175_s28 }
   0xe   : > { %s865_s30 = smov [#allocation7]   ;;  %s706_s9 = scalar_lea.hbm %s1142_s1, 256 }
   0xf   : > { %p637_p9 = pneg %p942_p8  ;;  %s191_s6 = sshll.u32 %s865_s30, 4  ;;  %s957_s6 = int_to_ptr.vmem [resolvable:$true] %s191_s6 }
  0x10   : > { %p707_p12 = scmp.ne.s32.totalorder %s1142_s1, %s706_s9  ;;  %p713_p5 = scmp.lt.u32.totalorder %s706_s9, %s1142_s1 }
  0x11   : > { %p953_p11 = pnand %p637_p9, %p1147_p1 }
  0x13   : > { %p708_p13 = pneg %p953_p11 }
  0x15   : > { %p709_p0 = pnand %p708_p13, %p707_p12 }
  0x17   : > { %p710_p3 = pneg %p709_p0 }
  0x19   : > { %p715_p7 = pnand %p713_p5, %p710_p3 }
  0x1b   : > { %718 = shalt.err (!%p715_p7)
}
  0x1c   : > { %s719_s14 = scalar_lea.vmem %s946_s28, 256  ;;  %p727_p2 = scmp.lt.s32.totalorder %s946_s28, %s946_s28 }
  0x1d   : > { %p720_p9 = scmp.ne.s32.totalorder %s946_s28, %s719_s14  ;;  %p728_p12 = scmp.lt.s32.totalorder %s719_s14, %s719_s14 }
  0x1f   : > { %p722_p10 = pnand %p720_p9, %p708_p13  ;;  %p729_p0 = por %p728_p12, %p727_p2 }
  0x21   : > { %p723_p1 = pneg %p722_p10 }
  0x23   : > { %p730_p6 = pnand %p729_p0, %p723_p1 }
  0x25   : > { %733 = shalt.err (!%p730_p6)
}
  0x26   : > { %s866_s15 = smov 64   ;;  %s867_s16 = smov 4  }
  0x27   : > { %640 = dma.hbm_to_vmem [thread:$0]  (!%p953_p11), %s1142_s1, 256, %s946_s28, [#allocation6], %s866_s15, %s866_s15, %s867_s16  }
  0x28   : > { %s734_s7 = scalar_lea.hbm %s1144_s3, 1024 }
  0x29   : > { %p735_p2 = scmp.ne.s32.totalorder %s1144_s3, %s734_s7  ;;  %p741_p10 = scmp.lt.u32.totalorder %s734_s7, %s1144_s3 }
  0x2b   : > { %p737_p1 = pnand %p735_p2, %p708_p13 }
  0x2d   : > { %p738_p6 = pneg %p737_p1 }
  0x2f   : > { %p743_p3 = pnand %p741_p10, %p738_p6 }
  0x31   : > { %746 = shalt.err (!%p743_p3)
}
  0x32   : > { %s747_s28 = scalar_lea.vmem %s957_s6, 1024  ;;  %p755_p12 = scmp.lt.s32.totalorder %s957_s6, %s957_s6 }
  0x33   : > { %p748_p5 = scmp.ne.s32.totalorder %s957_s6, %s747_s28  ;;  %p756_p0 = scmp.lt.s32.totalorder %s747_s28, %s747_s28 }
  0x35   : > { %p750_p7 = pnand %p748_p5, %p708_p13  ;;  %p757_p2 = por %p756_p0, %p755_p12 }
  0x37   : > { %p751_p9 = pneg %p750_p7 }
  0x39   : > { %p758_p1 = pnand %p757_p2, %p751_p9 }
  0x3b   : > { %761 = shalt.err (!%p758_p1)
}
  0x3c   : > { %643 = dma.hbm_to_vmem [thread:$0]  (!%p953_p11), %s1144_s3, 1024, %s957_s6, [#allocation6], %s866_s15, %s866_s15, %s867_s16  }
  0x3d   : > { %s1012_s14 = sadd.s32 1, %s862_s21   ;;  %s29_s29 = sadd.s32 1, %s858_s20 }
  0x3e   : > { %s26_s17 = ssub.s32 %s862_s21, %s1012_s14  ;;  %p36_p13 = scmp.ne.s32.totalorder %s858_s20, %s854_s19 }
  0x3f   : > { %p27_p6 = scmp.eq.s32.totalorder %s26_s17, 0  ;;  %p37_p10 = scmp.eq.s32.totalorder %s862_s21, 0 }
  0x40   : > { %p1154_p3 = scmp.eq.s32.totalorder %s923_s22, 1  ;;  %p654_p7 = scmp.lt.s32.totalorder %s862_s21, 2 }
  0x41   : > { %s1028_s27 = scalar_select %p27_p6, %s858_s20, %s29_s29  }
  0x42   : > { %p1022_p5 = por %p1154_p3, %p36_p13  ;;  %p38_p9 = por %p37_p10, %p36_p13 }
  0x43   : > { %s208_s30 = sand.u32 1, %s858_s20   ;;  %s562_s6 = sshll.u32 %s862_s21, 7 }
  0x44   : > { %s1155_s23 = scalar_select %p1022_p5, 1, 0 }
  0x45   : > { %s561_s7 = sshll.u32 %s208_s30, 3  ;;  %s1035_s8 = scalar_lea.hbm %s1141_s0, %s562_s6 }
  0x46   : > { %s212_s9 = scalar_lea.vmem [#allocation2], %s561_s7  ;;  %p1039_p11 = pnand %p654_p7, %p38_p9 }
  0x47   : > { %s219_s10 = sshll.u32 %s212_s9, 4  ;;  %s209_s28 = scalar_lea.sflag [#allocation3], %s208_s30  ;;  %s1037_s10 = int_to_ptr.vmem [resolvable:$true] %s219_s10 }
  0x48   : > { %s762_s12 = scalar_lea.hbm %s1035_s8, 128  ;;  %p764_p0 = pneg %p1039_p11 }
  0x49   : > { %p763_p12 = scmp.ne.s32.totalorder %s1035_s8, %s762_s12  ;;  %s767_s17 = scalar_lea.hbm %s1141_s0, 256 }
  0x4a   : > { %p768_p13 = scmp.lt.u32.totalorder %s1035_s8, %s1141_s0  ;;  %p769_p6 = scmp.lt.u32.totalorder %s767_s17, %s762_s12 }
  0x4b   : > { %p765_p2 = pnand %p764_p0, %p763_p12  ;;  %p771_p3 = scmp.lt.u32.totalorder %s762_s12, %s1035_s8 }
  0x4c   : > { %p770_p10 = por %p769_p6, %p768_p13 }
  0x4d   : > { %p766_p1 = pneg %p765_p2 }
  0x4e   : > { %p772_p7 = por %p771_p3, %p770_p10 }
  0x50   : > { %p773_p9 = pnand %p772_p7, %p766_p1 }
  0x52   : > { %776 = shalt.err (!%p773_p9)
}
  0x53   : > { %s777_s30 = scalar_lea.vmem %s1037_s10, 128  ;;  %s868_s15 = smov [#allocation2]  }
  0x54   : > { %p778_p12 = scmp.ne.s32.totalorder %s1037_s10, %s777_s30  ;;  %s782_s16 = sshll.u32 %s868_s15, 4  ;;  %s783_s16 = int_to_ptr.vmem [resolvable:$false] %s782_s16 }
  0x55   : > { %s784_s9 = scalar_lea.vmem %s783_s16, 256  ;;  %p785_p4 = scmp.lt.s32.totalorder %s1037_s10, %s783_s16 }
  0x56   : > { %p780_p2 = pnand %p778_p12, %p764_p0  ;;  %p786_p13 = scmp.lt.s32.totalorder %s784_s9, %s777_s30 }
  0x58   : > { %p781_p5 = pneg %p780_p2  ;;  %p787_p6 = por %p786_p13, %p785_p4 }
  0x5a   : > { %p788_p10 = pnand %p787_p6, %p781_p5 }
  0x5c   : > { %791 = shalt.err (!%p788_p10)
}
  0x5d   : > { %647 = dma.hbm_to_vmem [thread:$0]  (!%p1039_p11), %s1035_s8, 128, %s1037_s10, %s209_s28  }
  0x5e   : > { %228 = sbr.rel (%p942_p8) target bundleno = 561 (0x231), region = 40  ;;  %s1071_s12 = sand.u32 (!%p942_p8), 1, %s854_s19  }
  0x5f   : > { %s564_s13 = sshll.u32 (!%p942_p8), %s1071_s12, 3  ;;  %s231_s29 = scalar_lea.sflag (!%p942_p8), [#allocation3], %s1071_s12 }
  0x60   : > { %s234_s17 = scalar_lea.vmem (!%p942_p8), [#allocation2], %s564_s13  ;;  %p1157_p4 = scmp.ne.s32.totalorder (!%p942_p8), %s1150_s24, 0 }
  0x65   : > { %837 = dma.done.wait (%p1157_p4), %s231_s29, 128  }
  0x66   : > { %839 = vsyncadd (%p1157_p4), %s231_s29, 4294967168  ;;  %p1158_p5 = scmp.eq.s32.totalorder %s923_s22, 0 }
  0x68   : > { %841 = dma.done.wait (%p1158_p5), [#allocation6], 1280   ;;  %p1159_p8 = pmov %p1158_p5 }
  0x69   : > { %v869_v0 = vmov 0.0   ;;  %vm870_vm0 = vmmov 0   ;;  %v696_v1 = vld [vmem:[#allocation5] sm:$0xff]   ;;  %v697_v2 = vld [vmem:[#allocation5 + $0x8] sm:$0xff]   ;;  %v270_v3 = vld [vmem:[%s234_s17] sm:$0xff]  ;;  %vm295_vm1 = vcmask 261120  }
  0x6a   : > { %843 = vsyncadd (%p1159_p8), [#allocation6], 4294966016  ;;  %597 = vmatprep.subr.bf16.mxu0 %v869_v0  ;;  %601 = vmatprep.mubr.msk.bf16.mxu0 %vm870_vm0, %v869_v0  ;;  %v698_v4 = vld [vmem:[#allocation7] sm:$0xff]   ;;  %v271_v5 = vpack.c.bf16 %v270_v3, %v270_v3  ;;  %v699_v6 = vld [vmem:[#allocation7 + $0x8] sm:$0xff]   ;;  %s582_s11 = sshll.u32 %s923_s22, 7  ;;  %s268_s28 = scalar_lea.vmem [#allocation8], %s564_s13 }
  0x6b   : > { %605 = vmatprep.subr.bf16.mxu1 %v869_v0  ;;  %621 = vmatprep.mubr.msk.bf16.mxu1 %vm870_vm0, %v869_v0  ;;  %v700_v7 = vld [vmem:[#allocation7 + $0x10] sm:$0xff]   ;;  %v701_v8 = vld [vmem:[#allocation7 + $0x18] sm:$0xff]   ;;  %v702_v9 = vld [vmem:[#allocation7 + $0x20] sm:$0xff]   ;;  %s467_s7 = sshll.u32 %s268_s28, 4  ;;  %s1097_s15 = scalar_lea.hbm %s1146_s5, %s582_s11  ;;  %s1099_s7 = int_to_ptr.vmem [resolvable:$true] %s467_s7 }
  0x6c   : > { %598 = vmatpush3.bf16.msra.mxu0 %v696_v1  ;;  %606 = vmatpush3.bf16.msra.mxu1 %v698_v4  ;;  %v703_v10 = vld [vmem:[#allocation7 + $0x28] sm:$0xff]   ;;  %v704_v11 = vld [vmem:[#allocation7 + $0x30] sm:$0xff]   ;;  %v705_v12 = vld [vmem:[#allocation7 + $0x38] sm:$0xff]   ;;  %s454_s22 = scalar_lea.sflag [#allocation4], %s1071_s12  ;;  %s792_s16 = scalar_lea.vmem %s1099_s7, 128 }
  0x6d   : > { %599 = vmatprep.subr.bf16.mxu0 %v869_v0  ;;  %607 = vmatprep.subr.bf16.mxu1 %v869_v0  ;;  %v568_v13 = vld [vmem:[%s1143_s2] ss:$0 sm:$0xff]  ;;  %p793_p11 = scmp.ne.s32.totalorder %s1099_s7, %s792_s16  ;;  %p1160_p0 = scmp.ne.s32.totalorder %s1155_s23, 0 }
  0x6e   : > { %v572_v21 = vld [vmem:[%s1145_s4] ss:$0 sm:$0xff]  ;;  %s871_s9 = smov [#allocation8]  }
  0x6f   : > { %p794_p1 = pnand %p793_p11, %p1160_p0  ;;  %s796_s13 = sshll.u32 %s871_s9, 4  ;;  %s797_s13 = int_to_ptr.vmem [resolvable:$false] %s796_s13 }
  0x70   : > { %600 = vmatpush3.bf16.msra.mxu0 %v697_v2  ;;  %608 = vmatpush3.bf16.msra.mxu1 %v699_v6  ;;  %s798_s29 = scalar_lea.vmem %s797_s13, 256  ;;  %p799_p7 = scmp.lt.s32.totalorder %s1099_s7, %s797_s13 }
  0x71   : > { %609 = vmatprep.subr.bf16.mxu1 %v869_v0  ;;  %p795_p3 = pneg %p794_p1  ;;  %p800_p9 = scmp.lt.s32.totalorder %s798_s29, %s792_s16 }
  0x73   : > { %602 = vmatmul.mubr.msk.bf16.vlgmr.msra.gmra.mrb[0].mxu0 %vm295_vm1, %v271_v5  ;;  %p801_p12 = por %p800_p9, %p799_p7 }
  0x74   : > { %610 = vmatpush3.bf16.msra.mxu1 %v700_v7 }
  0x75   : > { %611 = vmatprep.subr.bf16.mxu1 %v869_v0  ;;  %p802_p2 = pnand %p801_p12, %p795_p3 }
  0x78   : > { %612 = vmatpush3.bf16.msra.mxu1 %v701_v8 }
  0x79   : > { %613 = vmatprep.subr.bf16.mxu1 %v869_v0 }
  0x7c   : > { %614 = vmatpush3.bf16.msra.mxu1 %v702_v9 }
  0x7d   : > { %615 = vmatprep.subr.bf16.mxu1 %v869_v0 }
  0x80   : > { %616 = vmatpush3.bf16.msra.mxu1 %v703_v10 }
  0x81   : > { %617 = vmatprep.subr.bf16.mxu1 %v869_v0 }
  0x84   : > { %618 = vmatpush3.bf16.msra.mxu1 %v704_v11 }
  0x85   : > { %619 = vmatprep.subr.bf16.mxu1 %v869_v0 }
  0x88   : > { %620 = vmatpush3.bf16.msra.mxu1 %v705_v12 }
 0x146   : > { %v333_v14 = vpop.f32.mrb[0].mxu0 }
 0x147   : > { %v334_v15 = vadd.f32 %v568_v13, %v333_v14  ;;  %v603_v16 = vpop.f32.mrb[1].mxu0 }
 0x148   : > { %v336_v17 = vpop.f32.mrb[2].mxu0 }
 0x149   : > { %v339_v18 = vmax.f32 %v334_v15, 0.0  ;;  %v604_v19 = vpop.f32.mrb[3].mxu0 }
 0x14b   : > { %v340_v20 = vpack.c.bf16 %v339_v18, %v339_v18 }
 0x14d   : > { %622 = vmatmul.mubr.bf16.vlgmr.msra.gmra.mrb[0].mxu1 %v340_v20 }
 0x220   : > { %v446_v22 = vpop.f32.mrb[0].mxu1 }
 0x221   : > { %v447_v23 = vadd.f32 %v572_v21, %v446_v22  ;;  %v623_v24 = vpop.f32.mrb[1].mxu1 }
 0x222   : > { %v449_v25 = vpop.f32.mrb[2].mxu1 }
 0x223   : > { %452 = vst [vmem:[%s268_s28] sm:$0xff] %v447_v23  ;;  %v624_v26 = vpop.f32.mrb[3].mxu1 }
 0x224   : > { %805 = shalt.err (!%p802_p2)
}
 0x225   : > { %s806_s12 = scalar_lea.hbm %s1097_s15, 128  ;;  %s810_s26 = scalar_lea.hbm %s1146_s5, 256 }
 0x226   : > { %p807_p13 = scmp.ne.s32.totalorder %s1097_s15, %s806_s12  ;;  %p811_p4 = scmp.lt.u32.totalorder %s1097_s15, %s1146_s5 }
 0x227   : > { %p812_p5 = scmp.lt.u32.totalorder %s810_s26, %s806_s12  ;;  %p814_p11 = scmp.lt.u32.totalorder %s806_s12, %s1097_s15 }
 0x228   : > { %p808_p6 = pnand %p807_p13, %p1160_p0 }
 0x229   : > { %p813_p8 = por %p812_p5, %p811_p4 }
 0x22a   : > { %p809_p10 = pneg %p808_p6 }
 0x22b   : > { %p815_p1 = por %p814_p11, %p813_p8 }
 0x22d   : > { %p816_p3 = pnand %p815_p1, %p809_p10 }
 0x22f   : > { %819 = shalt.err (!%p816_p3)
}
 0x230   : > { %635 = dma.vmem_to_hbm [thread:$0]  (%p1160_p0), %s1099_s7, 128, %s1097_s15, %s454_s22  }
 0x231 PF: > { %s479_s11 = sand.u32 1, %s850_s18   ;;  %p1161_p7 = scmp.ne.s32.totalorder %s1151_s25, 0 }
 0x232   : > { %p1162_p9 = scmp.ge.s32.totalorder %s862_s21, 2  ;;  %s480_s28 = scalar_lea.sflag [#allocation4], %s479_s11 }
 0x234   : > { %p649_p12 = pnand %p1162_p9, %p1161_p7 }
 0x236   : > { %845 = dma.done.wait (!%p649_p12), %s480_s28, 128  }
 0x237   : > { %847 = vsyncadd (!%p649_p12), %s480_s28, 4294967168  ;;  %p19_p2 = scmp.ge.s32.totalorder %s1012_s14, 4   ;;  %s1163_s18 = smov %s854_s19 }
 0x238   : > { %s1164_s19 = smov %s858_s20  ;;  %s1165_s20 = smov %s1028_s27 }
 0x239   : > { %s1166_s21 = smov %s1012_s14  ;;  %21 = sbr.rel (!%p19_p2) target bundleno = 6 (0x6), region = 93 }
 0x240   :  { %485 = vsyncpa [#allocation3], 1 }
 0x241   :  { %487 = vsyncpa [#allocation3 + $0x1], 1 }
 0x242   :  { %488 = vsyncpa [#allocation6], 1 }
 0x243   :  { %489 = vsyncpa [#allocation4], 1 }
 0x244   :  { %491 = vsyncpa [#allocation4 + $0x1], 1 }

// kernel: tpu_custom_call.1
= control target key start
LH: loop header
LB: loop body
LE: loop exit
PB: predicated region body
PF: predicated region fallthrough
CT: control target
= control target key end

     0   :  { %10 = vsyncpa [#allocation3], 0  ;;  %s1141_s0 = inlined_call_operand.hbm [shape: f32[16,32], index: 0, kind: input, shape index: {}]   ;;  %s1142_s1 = inlined_call_operand.hbm [shape: bf16[32,128], index: 1, kind: input, shape index: {}]   ;;  %s1143_s2 = inlined_call_operand.vmem [shape: f32[1,128], index: 2, kind: input, shape index: {}]   ;;  %s1144_s3 = inlined_call_operand.hbm [shape: bf16[128,128], index: 3, kind: input, shape index: {}]   ;;  %s1145_s4 = inlined_call_operand.vmem [shape: f32[1,128], index: 4, kind: input, shape index: {}]   ;;  %s1146_s5 = inlined_call_operand.hbm [shape: f32[16,128], index: 5, kind: output, shape index: {}]  }
   0x1   :  { %12 = vsyncpa [#allocation3 + $0x1], 0 }
   0x2   :  { %13 = vsyncpa [#allocation6], 0 }
   0x3   :  { %14 = vsyncpa [#allocation4], 0 }
   0x4   :  { %16 = vsyncpa [#allocation4 + $0x1], 0  ;;  %s902_s18 = smov 0   ;;  %s904_s19 = smov 0  }
   0x5   :  { %s906_s20 = smov 0   ;;  %s908_s21 = smov 0  }
   0x6 LB: > { %s923_s22 = sadd.s32 4294967295, %s862_s21   ;;  %s556_s23 = sadd.s32 4294967294, %s862_s21   ;;  %s862_s21 = sphi %s908_s21, %s1166_s21   ;;  %s858_s20 = sphi %s906_s20, %s1165_s20   ;;  %s854_s19 = sphi %s904_s19, %s1164_s19   ;;  %s850_s18 = sphi %s902_s18, %s1163_s18  }
   0x7   : > { %p42_p0 = scmp.ne.s32.totalorder %s854_s19, %s850_s18  ;;  %p1147_p1 = scmp.eq.s32.totalorder %s923_s22, 0 }
   0x8   : > { %p156_p3 = scmp.eq.s32.totalorder %s556_s23, 1  ;;  %p557_p5 = scmp.ge.s32.totalorder %s862_s21, 1 }
   0x9   : > { %p932_p4 = por %p1147_p1, %p42_p0  ;;  %p163_p7 = scmp.lt.s32.totalorder %s862_s21, 3 }
   0xa   : > { %p937_p6 = por %p156_p3, %p42_p0  ;;  %s864_s27 = smov [#allocation5]  }
   0xb   : > { %s1150_s24 = scalar_select %p932_p4, 1, 0 }
   0xc   : > { %s1151_s25 = scalar_select %p937_p6, 1, 0 }
   0xd   : > { %p942_p8 = pnand %p557_p5, %p163_p7  ;;  %s175_s28 = sshll.u32 %s864_s27, 4  ;;  %s946_s28 = int_to_ptr.vmem [resolvable:$true] %s175_s28 }
   0xe   : > { %s865_s30 = smov [#allocation7]   ;;  %s706_s9 = scalar_lea.hbm %s1142_s1, 256 }
   0xf   : > { %p637_p9 = pneg %p942_p8  ;;  %s191_s6 = sshll.u32 %s865_s30, 4  ;;  %s957_s6 = int_to_ptr.vmem [resolvable:$true] %s191_s6 }
  0x10   : > { %p707_p12 = scmp.ne.s32.totalorder %s1142_s1, %s706_s9  ;;  %p713_p5 = scmp.lt.u32.totalorder %s706_s9, %s1142_s1 }
  0x11   : > { %p953_p11 = pnand %p637_p9, %p1147_p1 }
  0x13   : > { %p708_p13 = pneg %p953_p11 }
  0x15   : > { %p709_p0 = pnand %p708_p13, %p707_p12 }
  0x17   : > { %p710_p3 = pneg %p709_p0 }
  0x19   : > { %p715_p7 = pnand %p713_p5, %p710_p3 }
  0x1b   : > { %718 = shalt.err (!%p715_p7)
}
  0x1c   : > { %s719_s14 = scalar_lea.vmem %s946_s28, 256  ;;  %p727_p2 = scmp.lt.s32.totalorder %s946_s28, %s946_s28 }
  0x1d   : > { %p720_p9 = scmp.ne.s32.totalorder %s946_s28, %s719_s14  ;;  %p728_p12 = scmp.lt.s32.totalorder %s719_s14, %s719_s14 }
  0x1f   : > { %p722_p10 = pnand %p720_p9, %p708_p13  ;;  %p729_p0 = por %p728_p12, %p727_p2 }
  0x21   : > { %p723_p1 = pneg %p722_p10 }
  0x23   : > { %p730_p6 = pnand %p729_p0, %p723_p1 }
  0x25   : > { %733 = shalt.err (!%p730_p6)
}
  0x26   : > { %s866_s15 = smov 64   ;;  %s867_s16 = smov 4  }
  0x27   : > { %640 = dma.hbm_to_vmem [thread:$0]  (!%p953_p11), %s1142_s1, 256, %s946_s28, [#allocation6], %s866_s15, %s866_s15, %s867_s16  }
  0x28   : > { %s734_s7 = scalar_lea.hbm %s1144_s3, 1024 }
  0x29   : > { %p735_p2 = scmp.ne.s32.totalorder %s1144_s3, %s734_s7  ;;  %p741_p10 = scmp.lt.u32.totalorder %s734_s7, %s1144_s3 }
  0x2b   : > { %p737_p1 = pnand %p735_p2, %p708_p13 }
  0x2d   : > { %p738_p6 = pneg %p737_p1 }
  0x2f   : > { %p743_p3 = pnand %p741_p10, %p738_p6 }
  0x31   : > { %746 = shalt.err (!%p743_p3)
}
  0x32   : > { %s747_s28 = scalar_lea.vmem %s957_s6, 1024  ;;  %p755_p12 = scmp.lt.s32.totalorder %s957_s6, %s957_s6 }
  0x33   : > { %p748_p5 = scmp.ne.s32.totalorder %s957_s6, %s747_s28  ;;  %p756_p0 = scmp.lt.s32.totalorder %s747_s28, %s747_s28 }
  0x35   : > { %p750_p7 = pnand %p748_p5, %p708_p13  ;;  %p757_p2 = por %p756_p0, %p755_p12 }
  0x37   : > { %p751_p9 = pneg %p750_p7 }
  0x39   : > { %p758_p1 = pnand %p757_p2, %p751_p9 }
  0x3b   : > { %761 = shalt.err (!%p758_p1)
}
  0x3c   : > { %643 = dma.hbm_to_vmem [thread:$0]  (!%p953_p11), %s1144_s3, 1024, %s957_s6, [#allocation6], %s866_s15, %s866_s15, %s867_s16  }
  0x3d   : > { %s1012_s14 = sadd.s32 1, %s862_s21   ;;  %s29_s29 = sadd.s32 1, %s858_s20 }
  0x3e   : > { %s26_s17 = ssub.s32 %s862_s21, %s1012_s14  ;;  %p36_p13 = scmp.ne.s32.totalorder %s858_s20, %s854_s19 }
  0x3f   : > { %p27_p6 = scmp.eq.s32.totalorder %s26_s17, 0  ;;  %p37_p10 = scmp.eq.s32.totalorder %s862_s21, 0 }
  0x40   : > { %p1154_p3 = scmp.eq.s32.totalorder %s923_s22, 1  ;;  %p654_p7 = scmp.lt.s32.totalorder %s862_s21, 2 }
  0x41   : > { %s1028_s27 = scalar_select %p27_p6, %s858_s20, %s29_s29  }
  0x42   : > { %p1022_p5 = por %p1154_p3, %p36_p13  ;;  %p38_p9 = por %p37_p10, %p36_p13 }
  0x43   : > { %s208_s30 = sand.u32 1, %s858_s20   ;;  %s562_s6 = sshll.u32 %s862_s21, 7 }
  0x44   : > { %s1155_s23 = scalar_select %p1022_p5, 1, 0 }
  0x45   : > { %s561_s7 = sshll.u32 %s208_s30, 3  ;;  %s1035_s8 = scalar_lea.hbm %s1141_s0, %s562_s6 }
  0x46   : > { %s212_s9 = scalar_lea.vmem [#allocation2], %s561_s7  ;;  %p1039_p11 = pnand %p654_p7, %p38_p9 }
  0x47   : > { %s219_s10 = sshll.u32 %s212_s9, 4  ;;  %s209_s28 = scalar_lea.sflag [#allocation3], %s208_s30  ;;  %s1037_s10 = int_to_ptr.vmem [resolvable:$true] %s219_s10 }
  0x48   : > { %s762_s12 = scalar_lea.hbm %s1035_s8, 128  ;;  %p764_p0 = pneg %p1039_p11 }
  0x49   : > { %p763_p12 = scmp.ne.s32.totalorder %s1035_s8, %s762_s12  ;;  %s767_s17 = scalar_lea.hbm %s1141_s0, 256 }
  0x4a   : > { %p768_p13 = scmp.lt.u32.totalorder %s1035_s8, %s1141_s0  ;;  %p769_p6 = scmp.lt.u32.totalorder %s767_s17, %s762_s12 }
  0x4b   : > { %p765_p2 = pnand %p764_p0, %p763_p12  ;;  %p771_p3 = scmp.lt.u32.totalorder %s762_s12, %s1035_s8 }
  0x4c   : > { %p770_p10 = por %p769_p6, %p768_p13 }
  0x4d   : > { %p766_p1 = pneg %p765_p2 }
  0x4e   : > { %p772_p7 = por %p771_p3, %p770_p10 }
  0x50   : > { %p773_p9 = pnand %p772_p7, %p766_p1 }
  0x52   : > { %776 = shalt.err (!%p773_p9)
}
  0x53   : > { %s777_s30 = scalar_lea.vmem %s1037_s10, 128  ;;  %s868_s15 = smov [#allocation2]  }
  0x54   : > { %p778_p12 = scmp.ne.s32.totalorder %s1037_s10, %s777_s30  ;;  %s782_s16 = sshll.u32 %s868_s15, 4  ;;  %s783_s16 = int_to_ptr.vmem [resolvable:$false] %s782_s16 }
  0x55   : > { %s784_s9 = scalar_lea.vmem %s783_s16, 256  ;;  %p785_p4 = scmp.lt.s32.totalorder %s1037_s10, %s783_s16 }
  0x56   : > { %p780_p2 = pnand %p778_p12, %p764_p0  ;;  %p786_p13 = scmp.lt.s32.totalorder %s784_s9, %s777_s30 }
  0x58   : > { %p781_p5 = pneg %p780_p2  ;;  %p787_p6 = por %p786_p13, %p785_p4 }
  0x5a   : > { %p788_p10 = pnand %p787_p6, %p781_p5 }
  0x5c   : > { %791 = shalt.err (!%p788_p10)
}
  0x5d   : > { %647 = dma.hbm_to_vmem [thread:$0]  (!%p1039_p11), %s1035_s8, 128, %s1037_s10, %s209_s28  }
  0x5e   : > { %228 = sbr.rel (%p942_p8) target bundleno = 561 (0x231), region = 40  ;;  %s1071_s12 = sand.u32 (!%p942_p8), 1, %s854_s19  }
  0x5f   : > { %s564_s13 = sshll.u32 (!%p942_p8), %s1071_s12, 3  ;;  %s231_s29 = scalar_lea.sflag (!%p942_p8), [#allocation3], %s1071_s12 }
  0x60   : > { %s234_s17 = scalar_lea.vmem (!%p942_p8), [#allocation2], %s564_s13  ;;  %p1157_p4 = scmp.ne.s32.totalorder (!%p942_p8), %s1150_s24, 0 }
  0x65   : > { %837 = dma.done.wait (%p1157_p4), %s231_s29, 128  }
  0x66   : > { %839 = vsyncadd (%p1157_p4), %s231_s29, 4294967168  ;;  %p1158_p5 = scmp.eq.s32.totalorder %s923_s22, 0 }
  0x68   : > { %841 = dma.done.wait (%p1158_p5), [#allocation6], 1280   ;;  %p1159_p8 = pmov %p1158_p5 }
  0x69   : > { %v869_v0 = vmov 0.0   ;;  %vm870_vm0 = vmmov 0   ;;  %v696_v1 = vld [vmem:[#allocation5] sm:$0xff]   ;;  %v697_v2 = vld [vmem:[#allocation5 + $0x8] sm:$0xff]   ;;  %v270_v3 = vld [vmem:[%s234_s17] sm:$0xff]  ;;  %vm295_vm1 = vcmask 261120  }
  0x6a   : > { %843 = vsyncadd (%p1159_p8), [#allocation6], 4294966016  ;;  %597 = vmatprep.subr.bf16.mxu0 %v869_v0  ;;  %601 = vmatprep.mubr.msk.bf16.mxu0 %vm870_vm0, %v869_v0  ;;  %v698_v4 = vld [vmem:[#allocation7] sm:$0xff]   ;;  %v271_v5 = vpack.c.bf16 %v270_v3, %v270_v3  ;;  %v699_v6 = vld [vmem:[#allocation7 + $0x8] sm:$0xff]   ;;  %s582_s11 = sshll.u32 %s923_s22, 7  ;;  %s268_s28 = scalar_lea.vmem [#allocation8], %s564_s13 }
  0x6b   : > { %605 = vmatprep.subr.bf16.mxu1 %v869_v0  ;;  %621 = vmatprep.mubr.msk.bf16.mxu1 %vm870_vm0, %v869_v0  ;;  %v700_v7 = vld [vmem:[#allocation7 + $0x10] sm:$0xff]   ;;  %v701_v8 = vld [vmem:[#allocation7 + $0x18] sm:$0xff]   ;;  %v702_v9 = vld [vmem:[#allocation7 + $0x20] sm:$0xff]   ;;  %s467_s7 = sshll.u32 %s268_s28, 4  ;;  %s1097_s15 = scalar_lea.hbm %s1146_s5, %s582_s11  ;;  %s1099_s7 = int_to_ptr.vmem [resolvable:$true] %s467_s7 }
  0x6c   : > { %598 = vmatpush3.bf16.msra.mxu0 %v696_v1  ;;  %606 = vmatpush3.bf16.msra.mxu1 %v698_v4  ;;  %v703_v10 = vld [vmem:[#allocation7 + $0x28] sm:$0xff]   ;;  %v704_v11 = vld [vmem:[#allocation7 + $0x30] sm:$0xff]   ;;  %v705_v12 = vld [vmem:[#allocation7 + $0x38] sm:$0xff]   ;;  %s454_s22 = scalar_lea.sflag [#allocation4], %s1071_s12  ;;  %s792_s16 = scalar_lea.vmem %s1099_s7, 128 }
  0x6d   : > { %599 = vmatprep.subr.bf16.mxu0 %v869_v0  ;;  %607 = vmatprep.subr.bf16.mxu1 %v869_v0  ;;  %v568_v13 = vld [vmem:[%s1143_s2] ss:$0 sm:$0xff]  ;;  %p793_p11 = scmp.ne.s32.totalorder %s1099_s7, %s792_s16  ;;  %p1160_p0 = scmp.ne.s32.totalorder %s1155_s23, 0 }
  0x6e   : > { %v572_v21 = vld [vmem:[%s1145_s4] ss:$0 sm:$0xff]  ;;  %s871_s9 = smov [#allocation8]  }
  0x6f   : > { %p794_p1 = pnand %p793_p11, %p1160_p0  ;;  %s796_s13 = sshll.u32 %s871_s9, 4  ;;  %s797_s13 = int_to_ptr.vmem [resolvable:$false] %s796_s13 }
  0x70   : > { %600 = vmatpush3.bf16.msra.mxu0 %v697_v2  ;;  %608 = vmatpush3.bf16.msra.mxu1 %v699_v6  ;;  %s798_s29 = scalar_lea.vmem %s797_s13, 256  ;;  %p799_p7 = scmp.lt.s32.totalorder %s1099_s7, %s797_s13 }
  0x71   : > { %609 = vmatprep.subr.bf16.mxu1 %v869_v0  ;;  %p795_p3 = pneg %p794_p1  ;;  %p800_p9 = scmp.lt.s32.totalorder %s798_s29, %s792_s16 }
  0x73   : > { %602 = vmatmul.mubr.msk.bf16.vlgmr.msra.gmra.mrb[0].mxu0 %vm295_vm1, %v271_v5  ;;  %p801_p12 = por %p800_p9, %p799_p7 }
  0x74   : > { %610 = vmatpush3.bf16.msra.mxu1 %v700_v7 }
  0x75   : > { %611 = vmatprep.subr.bf16.mxu1 %v869_v0  ;;  %p802_p2 = pnand %p801_p12, %p795_p3 }
  0x78   : > { %612 = vmatpush3.bf16.msra.mxu1 %v701_v8 }
  0x79   : > { %613 = vmatprep.subr.bf16.mxu1 %v869_v0 }
  0x7c   : > { %614 = vmatpush3.bf16.msra.mxu1 %v702_v9 }
  0x7d   : > { %615 = vmatprep.subr.bf16.mxu1 %v869_v0 }
  0x80   : > { %616 = vmatpush3.bf16.msra.mxu1 %v703_v10 }
  0x81   : > { %617 = vmatprep.subr.bf16.mxu1 %v869_v0 }
  0x84   : > { %618 = vmatpush3.bf16.msra.mxu1 %v704_v11 }
  0x85   : > { %619 = vmatprep.subr.bf16.mxu1 %v869_v0 }
  0x88   : > { %620 = vmatpush3.bf16.msra.mxu1 %v705_v12 }
 0x146   : > { %v333_v14 = vpop.f32.mrb[0].mxu0 }
 0x147   : > { %v334_v15 = vadd.f32 %v568_v13, %v333_v14  ;;  %v603_v16 = vpop.f32.mrb[1].mxu0 }
 0x148   : > { %v336_v17 = vpop.f32.mrb[2].mxu0 }
 0x149   : > { %v339_v18 = vmax.f32 %v334_v15, 0.0  ;;  %v604_v19 = vpop.f32.mrb[3].mxu0 }
 0x14b   : > { %v340_v20 = vpack.c.bf16 %v339_v18, %v339_v18 }
 0x14d   : > { %622 = vmatmul.mubr.bf16.vlgmr.msra.gmra.mrb[0].mxu1 %v340_v20 }
 0x220   : > { %v446_v22 = vpop.f32.mrb[0].mxu1 }
 0x221   : > { %v447_v23 = vadd.f32 %v572_v21, %v446_v22  ;;  %v623_v24 = vpop.f32.mrb[1].mxu1 }
 0x222   : > { %v449_v25 = vpop.f32.mrb[2].mxu1 }
 0x223   : > { %452 = vst [vmem:[%s268_s28] sm:$0xff] %v447_v23  ;;  %v624_v26 = vpop.f32.mrb[3].mxu1 }
 0x224   : > { %805 = shalt.err (!%p802_p2)
}
 0x225   : > { %s806_s12 = scalar_lea.hbm %s1097_s15, 128  ;;  %s810_s26 = scalar_lea.hbm %s1146_s5, 256 }
 0x226   : > { %p807_p13 = scmp.ne.s32.totalorder %s1097_s15, %s806_s12  ;;  %p811_p4 = scmp.lt.u32.totalorder %s1097_s15, %s1146_s5 }
 0x227   : > { %p812_p5 = scmp.lt.u32.totalorder %s810_s26, %s806_s12  ;;  %p814_p11 = scmp.lt.u32.totalorder %s806_s12, %s1097_s15 }
 0x228   : > { %p808_p6 = pnand %p807_p13, %p1160_p0 }
 0x229   : > { %p813_p8 = por %p812_p5, %p811_p4 }
 0x22a   : > { %p809_p10 = pneg %p808_p6 }
 0x22b   : > { %p815_p1 = por %p814_p11, %p813_p8 }
 0x22d   : > { %p816_p3 = pnand %p815_p1, %p809_p10 }
 0x22f   : > { %819 = shalt.err (!%p816_p3)
}
 0x230   : > { %635 = dma.vmem_to_hbm [thread:$0]  (%p1160_p0), %s1099_s7, 128, %s1097_s15, %s454_s22  }
 0x231 PF: > { %s479_s11 = sand.u32 1, %s850_s18   ;;  %p1161_p7 = scmp.ne.s32.totalorder %s1151_s25, 0 }
 0x232   : > { %p1162_p9 = scmp.ge.s32.totalorder %s862_s21, 2  ;;  %s480_s28 = scalar_lea.sflag [#allocation4], %s479_s11 }
 0x234   : > { %p649_p12 = pnand %p1162_p9, %p1161_p7 }
 0x236   : > { %845 = dma.done.wait (!%p649_p12), %s480_s28, 128  }
 0x237   : > { %847 = vsyncadd (!%p649_p12), %s480_s28, 4294967168  ;;  %p19_p2 = scmp.ge.s32.totalorder %s1012_s14, 4   ;;  %s1163_s18 = smov %s854_s19 }
 0x238   : > { %s1164_s19 = smov %s858_s20  ;;  %s1165_s20 = smov %s1028_s27 }
 0x239   : > { %s1166_s21 = smov %s1012_s14  ;;  %21 = sbr.rel (!%p19_p2) target bundleno = 6 (0x6), region = 93 }
 0x240   :  { %485 = vsyncpa [#allocation3], 1 }
 0x241   :  { %487 = vsyncpa [#allocation3 + $0x1], 1 }
 0x242   :  { %488 = vsyncpa [#allocation6], 1 }
 0x243   :  { %489 = vsyncpa [#allocation4], 1 }
 0x244   :  { %491 = vsyncpa [#allocation4 + $0x1], 1 }

</bundles_post_ra>
